<compile_context>
chip_gen: v7x
topology: tpu7x:2x2x1
jax: 0.10.0
libtpu: 0.0.40
codegen_flags: <defaults>
</compile_context>

<pallas_src>
import functools

import jax
import jax.numpy as jnp
from jax.experimental import pallas as pl
from jax.experimental.pallas import tpu as pltpu

_LANE = 128
_MIN_TILE = 8                       # f32 sublane quantum for row tiles
_VMEM_BUDGET = 12 * 1024 * 1024     # stay under v5e's 16 MiB default scoped VMEM


def _round_up(n, m):
    return ((n + m - 1) // m) * m


def _device_kind():
    try:
        return (jax.local_devices()[0].device_kind or "").lower()
    except Exception:
        return ""


def _num_tensorcores(kind):
    # v7x exposes 2 TensorCores to one Pallas grid; v5e/v6e have 1.
    return 2 if "v7" in kind else 1


def _deep_mxu(kind):
    # v6e / v7x MXUs are 256-deep; v5e is 128-deep.
    return ("v6" in kind) or ("v7" in kind)


def _pick_fold(M, F, deep):
    """Rows folded into one lane-dense row (fold*F fills 128 or 256 lanes).

    Falls back to fold=1 (lane-sparse but correct) when F does not divide 128
    or when no power-of-two fold divides the row count (so we never pad x).
    """
    if F >= _LANE or _LANE % F != 0:
        return 1
    fold = (_LANE // F) * (2 if deep else 1)
    while fold > 1 and M % fold != 0:
        fold //= 2
    return max(fold, 1)


def _linear_concat_kernel(x_ref, w_ref, b_ref, o_ref):
    # x_ref: (tm_f, Ff) native dtype   w_ref: (Ff, Kf) native dtype
    # b_ref: (1, Kf) f32               o_ref: (tm_f, Kf) out dtype
    acc = jnp.dot(x_ref[...], w_ref[...], preferred_element_type=jnp.float32)
    o_ref[...] = (acc + b_ref[...]).astype(o_ref.dtype)


@functools.partial(jax.jit, static_argnames=("tm_folded",))
def list_module_forward(x, w_stacked, b_stacked, *, tm_folded=4096):
    """Equivalent of ListModule.forward for K Linear(F->1) sub-modules.

    x:         (B, D1, D2, F)
    w_stacked: (F, K)   -- column k is the k-th module's weight
    b_stacked: (K,)     -- entry k is the k-th module's bias
    returns    (B, D1, D2, K)
    """
    B, D1, D2, F = x.shape
    K = w_stacked.shape[1]
    M = B * D1 * D2
    out_dtype = x.dtype
    itemsize = jnp.dtype(x.dtype).itemsize

    kind = _device_kind()
    fold = _pick_fold(M, F, _deep_mxu(kind))
    Ff, Kf = fold * F, fold * K
    M_f = M // fold

    # Fold x into lane-dense rows. Pure reshape: no dtype cast, no pad, so x is
    # streamed straight from HBM in its native dtype (4 B/elem floor).
    x_folded = x.reshape(M_f, Ff)

    # Block-diagonal stacked weight (kron(I_fold, W)) and tiled bias.
    if fold > 1:
        w_bd = jnp.kron(jnp.eye(fold, dtype=w_stacked.dtype), w_stacked)
    else:
        w_bd = w_stacked
    b_tiled = jnp.tile(b_stacked.astype(jnp.float32), fold).reshape(1, Kf)

    # ---- tile sizing ---------------------------------------------------------
    # Biggest row tile that keeps double-buffered (x tile + out tile) under the
    # VMEM budget (v5e's 16 MiB scoped default is the binding constraint).
    bytes_per_row = (Ff + Kf) * itemsize
    vmem_rows = max(_MIN_TILE,
                    (_VMEM_BUDGET // (2 * bytes_per_row)) // _MIN_TILE * _MIN_TILE)
    tm_f = max(_MIN_TILE, min(tm_folded, vmem_rows, _round_up(M_f, _MIN_TILE)))
    num_tiles = pl.cdiv(M_f, tm_f)

    # v7x only: 2 TensorCores share the "parallel" grid axis -> even tile count.
    if _num_tensorcores(kind) >= 2 and M_f > _MIN_TILE:
        target = max(2, num_tiles + (num_tiles % 2))
        tm_f = max(_MIN_TILE, _round_up(pl.cdiv(M_f, target), _MIN_TILE))
        num_tiles = pl.cdiv(M_f, tm_f)

    cost = pl.CostEstimate(
        flops=2 * M_f * Ff * Kf,
        transcendentals=0,
        bytes_accessed=(M_f * Ff + M_f * Kf + Ff * Kf) * itemsize,
    )

    grid_spec = pltpu.PrefetchScalarGridSpec(
        num_scalar_prefetch=0,
        grid=(num_tiles,),
        in_specs=[
            pl.BlockSpec((tm_f, Ff), lambda i: (i, 0)),   # streamed x tiles
            pl.BlockSpec((Ff, Kf), lambda i: (0, 0)),     # resident block-diag weight
            pl.BlockSpec((1, Kf), lambda i: (0, 0)),      # resident bias
        ],
        out_specs=pl.BlockSpec((tm_f, Kf), lambda i: (i, 0)),
    )

    out_folded = pl.pallas_call(
        _linear_concat_kernel,
        out_shape=jax.ShapeDtypeStruct((M_f, Kf), out_dtype),
        grid_spec=grid_spec,
        compiler_params=pltpu.CompilerParams(
            dimension_semantics=("parallel",),
        ),
        cost_estimate=cost,
    )(x_folded, w_bd, b_tiled)

    # Folded row i holds rows [i*fold, ..., i*fold+fold-1] x K outputs in order,
    # so a plain reshape recovers (B, D1, D2, K).
    return out_folded.reshape(B, D1, D2, K)


def reference_forward(x, w_stacked, b_stacked):
    """Pure-JAX f32 reference mirroring the PyTorch ListModule loop + cat."""
    B, D1, D2, F = x.shape
    x_flat = x.reshape(-1, F)
    preds = []
    for k in range(w_stacked.shape[1]):
        preds.append(x_flat @ w_stacked[:, k:k + 1] + b_stacked[k])
    preds = jnp.concatenate(preds, axis=-1)
    return preds.reshape(B, D1, D2, -1)


if __name__ == "__main__":
    # Small shapes consistent with the forward: x is 4-D, last dim = features.
    B, D1, D2, F = 2, 4, 16, 32
    K = 6  # number of sub-modules (Linear(F, 1) heads)

    key = jax.random.PRNGKey(0)
    kx, kw, kb = jax.random.split(key, 3)

    x = jax.random.normal(kx, (B, D1, D2, F), dtype=jnp.float32)
    # Deterministically initialized stacked parameters of the K linear heads.
    w_stacked = jax.random.normal(kw, (F, K), dtype=jnp.float32) * 0.1
    b_stacked = jax.random.normal(kb, (K,), dtype=jnp.float32) * 0.1

    out = jax.block_until_ready(list_module_forward(x, w_stacked, b_stacked))
    ref = reference_forward(x, w_stacked, b_stacked)

    assert out.shape == (B, D1, D2, K), out.shape
    # Native f32 streaming with f32 accumulation; tolerance only has to cover
    # the MXU's default reduced-precision f32 multiply passes (small F=32).
    assert jnp.allclose(out, ref, atol=1e-2, rtol=1e-2), (
        float(jnp.max(jnp.abs(out - ref))))

    print("KERNEL_OK")
</pallas_src>

<mosaic_0001>
module attributes {stable_mosaic.version = 11 : i64} {
  func.func @_linear_concat_kernel(%arg0: i32, %arg1: memref<32x128xf32, #tpu.memory_space<vmem>>, %arg2: memref<128x24xf32, #tpu.memory_space<vmem>>, %arg3: memref<1x24xf32, #tpu.memory_space<vmem>>, %arg4: memref<32x24xf32, #tpu.memory_space<vmem>>) attributes {dimension_semantics = [#tpu.dimension_semantics<parallel>], iteration_bounds = array<i64: 1>, scalar_prefetch = 0 : i64, scratch_operands = 0 : i64, tpu.core_type = #tpu.core_type<tc>, window_params = [{transform_indices = @transform_0, window_bounds = array<i64: 32, 128>}, {pipeline_mode = #tpu.pipeline_mode<synchronous>, transform_indices = @transform_1, window_bounds = array<i64: 128, 24>}, {pipeline_mode = #tpu.pipeline_mode<synchronous>, transform_indices = @transform_2, window_bounds = array<i64: 1, 24>}, {transform_indices = @transform_3, window_bounds = array<i64: 32, 24>}]} {
    %c0 = arith.constant 0 : index
    %c0_0 = arith.constant 0 : index
    %0 = vector.load %arg1[%c0, %c0_0] : memref<32x128xf32, #tpu.memory_space<vmem>>, vector<32x128xf32>
    %c0_1 = arith.constant 0 : index
    %c0_2 = arith.constant 0 : index
    %1 = vector.load %arg2[%c0_1, %c0_2] : memref<128x24xf32, #tpu.memory_space<vmem>>, vector<128x24xf32>
    %cst = arith.constant dense<0.000000e+00> : vector<32x24xf32>
    %2 = tpu.matmul %0, %1, %cst {dimension_numbers = #tpu.dot_dimension_numbers<[1], [0], [0], [1], [0, 0, 1, 1], [], []>} : vector<32x128xf32>, vector<128x24xf32>, vector<32x24xf32> -> vector<32x24xf32>
    %c0_3 = arith.constant 0 : index
    %c0_4 = arith.constant 0 : index
    %3 = vector.load %arg3[%c0_3, %c0_4] : memref<1x24xf32, #tpu.memory_space<vmem>>, vector<1x24xf32>
    %4 = vector.broadcast %3 : vector<1x24xf32> to vector<32x24xf32>
    %5 = arith.addf %2, %4 : vector<32x24xf32>
    %c0_5 = arith.constant 0 : index
    %c0_6 = arith.constant 0 : index
    %6 = vector.load %arg4[%c0_5, %c0_6] : memref<32x24xf32, #tpu.memory_space<vmem>>, vector<32x24xf32>
    tpu.vector_store %arg4[%c0_5, %c0_6], %5 {strides = array<i32>} : memref<32x24xf32, #tpu.memory_space<vmem>>, vector<32x24xf32>,
    return
  }
  func.func @transform_0(%arg0: i32) -> (i32, i32) {
    %c0_i32 = arith.constant 0 : i32
    %c0_i32_0 = arith.constant 0 : i32
    return %arg0, %c0_i32 : i32, i32
  }
  func.func @transform_1(%arg0: i32) -> (i32, i32) {
    %c0_i32 = arith.constant 0 : i32
    %c0_i32_0 = arith.constant 0 : i32
    %c0_i32_1 = arith.constant 0 : i32
    return %c0_i32, %c0_i32_0 : i32, i32
  }
  func.func @transform_2(%arg0: i32) -> (i32, i32) {
    %c0_i32 = arith.constant 0 : i32
    %c0_i32_0 = arith.constant 0 : i32
    %c0_i32_1 = arith.constant 0 : i32
    return %c0_i32, %c0_i32_0 : i32, i32
  }
  func.func @transform_3(%arg0: i32) -> (i32, i32) {
    %c0_i32 = arith.constant 0 : i32
    %c0_i32_0 = arith.constant 0 : i32
    return %arg0, %c0_i32 : i32, i32
  }
}

</mosaic_0001>

<bundles_post_ra>
// kernel: tile.8
= control target key start
LH: loop header
LB: loop body
LE: loop exit
PB: predicated region body
PF: predicated region fallthrough
CT: control target
= control target key end

     0   :  { %s22_s0 = inlined_call_operand.vmem [shape: f32[6], index: 0, kind: input, shape index: {}]   ;;  %s23_s1 = inlined_call_operand.vmem [shape: f32[4,6], index: 1, kind: output, shape index: {}]  }
   0x1   :  { %v4_v0 = vld [vmem:[%s22_s0] ss:$0 sm:$0xff] }
   0x2   :  { %5 = vst [vmem:[%s23_s1] sm:$0xf] %v4_v0 }

// kernel: tile.9
= control target key start
LH: loop header
LB: loop body
LE: loop exit
PB: predicated region body
PF: predicated region fallthrough
CT: control target
= control target key end

     0   :  { %vm7_vm0 = vcmask 48128   ;;  %s37_s8 = smov 6   ;;  %s38_s9 = smov 12   ;;  %vm13_vm1 = vcmask 195728   ;;  %vm19_vm2 = vcmask 146528   ;;  %vm25_vm3 = vcmask 97328   ;;  %s55_s0 = inlined_call_operand.vmem [shape: f32[4,6], index: 0, kind: input, shape index: {}]   ;;  %s56_s1 = inlined_call_operand.vmem [shape: f32[1,24], index: 1, kind: output, shape index: {}]  }
   0x1   :  { %v4_v0 = vld [vmem:[%s55_s0] sm:$0xf]  ;;  %s36_s0 = smov 18  }
   0x2   :  { %5 = vst [vmem:[#allocation1] sm:$0xf] %v4_v0 }
   0x9   :  { %v10_v1 = vld [vmem:[#allocation1 + $0x3] sm:$0x1]   ;;  %v22_v2 = vld [vmem:[#allocation1 + $0x1] sm:$0x1]   ;;  %v6_v3 = vld [vmem:[#allocation1] sm:$0x1]  }
   0xa   :  { %11 = vrot.lane.b32.xlu0 %v10_v1, %s36_s0  ;;  %23 = vrot.lane.b32.xlu1 %v22_v2, %s37_s8  ;;  %v16_v4 = vld [vmem:[#allocation1 + $0x2] sm:$0x1]   ;;  %8 = vst.msk [vmem:[#allocation0] sm:$0x1] %vm7_vm0, %v6_v3  }
   0xe   :  { %17 = vrot.lane.b32.xlu0 %v16_v4, %s38_s9 }
  0x7c   :  { %v12_v5 = vpop.permute.xlu0 %11   ;;  %v24_v6 = vpop.permute.xlu1 %23  }
  0x7d   :  { %14 = vst.msk [vmem:[#allocation0] sm:$0x1] %vm13_vm1, %v12_v5  }
  0x80   :  { %v18_v7 = vpop.permute.xlu0 %17  }
  0x81   :  { %20 = vst.msk [vmem:[#allocation0] sm:$0x1] %vm19_vm2, %v18_v7  }
  0x82   :  { %26 = vst.msk [vmem:[#allocation0] sm:$0x1] %vm25_vm3, %v24_v6  }
  0x89   :  { %v30_v8 = vld [vmem:[#allocation0] sm:$0x1] }
  0x8a   :  { %32 = vst [vmem:[%s56_s1] sm:$0x1] %v30_v8 }

// kernel: list_module_forward.1
= control target key start
LH: loop header
LB: loop body
LE: loop exit
PB: predicated region body
PF: predicated region fallthrough
CT: control target
= control target key end

     0   :  { %vm126_vm0 = vcmask 195584   ;;  %s337_s1 = inlined_call_operand.vmem [shape: f32[128,24], index: 1, kind: input, shape index: {}]   ;;  %s338_s0 = inlined_call_operand.vmem [shape: f32[32,128], index: 0, kind: input, shape index: {}]   ;;  %s339_s2 = inlined_call_operand.vmem [shape: f32[1,24], index: 2, kind: input, shape index: {}]   ;;  %s340_s3 = inlined_call_operand.vmem [shape: f32[32,24], index: 3, kind: output, shape index: {}]  }
   0x1   :  { %v18_v0 = vld [vmem:[%s337_s1] sm:$0xff]  ;;  %v19_v1 = vld [vmem:[%s337_s1 + $0x8] sm:$0xff]  ;;  %v20_v2 = vld [vmem:[%s337_s1 + $0x10] sm:$0xff] }
   0x2   :  { %v194_v3 = vpack.c.bf16 %v19_v1, %v18_v0  ;;  %v21_v4 = vld [vmem:[%s337_s1 + $0x18] sm:$0xff]  ;;  %v22_v6 = vld [vmem:[%s337_s1 + $0x20] sm:$0xff]  ;;  %v23_v7 = vld [vmem:[%s337_s1 + $0x28] sm:$0xff] }
   0x3   :  { %v198_v5 = vpack.c.bf16 %v21_v4, %v20_v2  ;;  %v202_v8 = vpack.c.bf16 %v23_v7, %v22_v6  ;;  %v14_v9 = vld [vmem:[%s338_s0] sm:$0xff]  ;;  %v16_v10 = vld [vmem:[%s338_s0 + $0x10] sm:$0xff]  ;;  %v25_v12 = vld [vmem:[%s337_s1 + $0x38] sm:$0xff] }
   0x4   :  { %195 = vmatprep.subr.bf16.mxu0 %v194_v3  ;;  %226 = vmatprep.subr.bf16.mxu1 %v194_v3  ;;  %v24_v11 = vld [vmem:[%s337_s1 + $0x30] sm:$0xff]  ;;  %v26_v14 = vld [vmem:[%s337_s1 + $0x40] sm:$0xff]  ;;  %v27_v15 = vld [vmem:[%s337_s1 + $0x48] sm:$0xff] }
   0x5   :  { %197 = vmatpush3.bf16.msra.mxu0 %v194_v3  ;;  %234 = vmatpush3.bf16.msra.mxu1 %v194_v3  ;;  %v206_v13 = vpack.c.bf16 %v25_v12, %v24_v11  ;;  %v210_v16 = vpack.c.bf16 %v27_v15, %v26_v14  ;;  %v28_v17 = vld [vmem:[%s337_s1 + $0x50] sm:$0xff]  ;;  %v29_v18 = vld [vmem:[%s337_s1 + $0x58] sm:$0xff]  ;;  %v30_v20 = vld [vmem:[%s337_s1 + $0x60] sm:$0xff] }
   0x6   :  { %199 = vmatprep.subr.bf16.mxu0 %v198_v5  ;;  %227 = vmatprep.subr.bf16.mxu1 %v198_v5  ;;  %v214_v19 = vpack.c.bf16 %v29_v18, %v28_v17  ;;  %v31_v21 = vld [vmem:[%s337_s1 + $0x68] sm:$0xff]  ;;  %v32_v23 = vld [vmem:[%s337_s1 + $0x70] sm:$0xff]  ;;  %v33_v24 = vld [vmem:[%s337_s1 + $0x78] sm:$0xff] }
   0x7   :  { %188 = vmatprep.mubr.f32.mxu0 %v14_v9  ;;  %191 = vmatprep.mubr.f32.mxu1 %v16_v10  ;;  %v218_v22 = vpack.c.bf16 %v31_v21, %v30_v20  ;;  %v222_v25 = vpack.c.bf16 %v33_v24, %v32_v23  ;;  %v15_v26 = vld [vmem:[%s338_s0 + $0x8] sm:$0xff]  ;;  %v17_v27 = vld [vmem:[%s338_s0 + $0x18] sm:$0xff]  ;;  %v135_v28 = vld [vmem:[%s339_s2] ss:$0 sm:$0xff] }
   0x9   :  { %201 = vmatpush3.bf16.msra.mxu0 %v198_v5  ;;  %235 = vmatpush3.bf16.msra.mxu1 %v198_v5 }
   0xa   :  { %203 = vmatprep.subr.bf16.mxu0 %v202_v8  ;;  %228 = vmatprep.subr.bf16.mxu1 %v202_v8 }
   0xd   :  { %205 = vmatpush3.bf16.msra.mxu0 %v202_v8  ;;  %236 = vmatpush3.bf16.msra.mxu1 %v202_v8 }
   0xe   :  { %207 = vmatprep.subr.bf16.mxu0 %v206_v13  ;;  %229 = vmatprep.subr.bf16.mxu1 %v206_v13 }
  0x11   :  { %209 = vmatpush3.bf16.msra.mxu0 %v206_v13  ;;  %237 = vmatpush3.bf16.msra.mxu1 %v206_v13 }
  0x12   :  { %211 = vmatprep.subr.bf16.mxu0 %v210_v16  ;;  %230 = vmatprep.subr.bf16.mxu1 %v210_v16 }
  0x15   :  { %213 = vmatpush3.bf16.msra.mxu0 %v210_v16  ;;  %238 = vmatpush3.bf16.msra.mxu1 %v210_v16 }
  0x16   :  { %215 = vmatprep.subr.bf16.mxu0 %v214_v19  ;;  %231 = vmatprep.subr.bf16.mxu1 %v214_v19 }
  0x19   :  { %217 = vmatpush3.bf16.msra.mxu0 %v214_v19  ;;  %239 = vmatpush3.bf16.msra.mxu1 %v214_v19 }
  0x1a   :  { %219 = vmatprep.subr.bf16.mxu0 %v218_v22  ;;  %232 = vmatprep.subr.bf16.mxu1 %v218_v22 }
  0x1d   :  { %221 = vmatpush3.bf16.msra.mxu0 %v218_v22  ;;  %240 = vmatpush3.bf16.msra.mxu1 %v218_v22 }
  0x1e   :  { %223 = vmatprep.subr.bf16.mxu0 %v222_v25  ;;  %233 = vmatprep.subr.bf16.mxu1 %v222_v25 }
  0x21   :  { %225 = vmatpush3.bf16.msra.mxu0 %v222_v25  ;;  %241 = vmatpush3.bf16.msra.mxu1 %v222_v25 }
  0x24   :  { %189 = vmatmul.mubr.f32.vlgmr.msra.gmra.mrb[0].mxu0 %v15_v26  ;;  %192 = vmatmul.mubr.f32.vlgmr.msra.gmra.mrb[0].mxu1 %v17_v27 }
  0xf7   :  { %v190_v29 = vpop.f32.mrb[0].mxu0  ;;  %v193_v30 = vpop.f32.mrb[0].mxu1 }
  0xf8   :  { %v113_v31 = vadd.f32 %v190_v29, %v135_v28  ;;  %v123_v32 = vadd.f32 %v193_v30, %v135_v28  ;;  %v107_v33 = vpop.f32.mrb[1].mxu0  ;;  %v117_v34 = vpop.f32.mrb[1].mxu1 }
  0xf9   :  { %v108_v35 = vadd.f32 %v135_v28, %v107_v33  ;;  %v118_v36 = vadd.f32 %v135_v28, %v117_v34 }
  0xfa   :  { %128 = vst.msk [vmem:[%s340_s3 + $0x8] sm:$0xff] %vm126_vm0, %v113_v31  ;;  %130 = vst.msk [vmem:[%s340_s3 + $0x18] sm:$0xff] %vm126_vm0, %v123_v32 }
  0xfb   :  { %127 = vst.msk [vmem:[%s340_s3] sm:$0xff] %vm126_vm0, %v108_v35  ;;  %129 = vst.msk [vmem:[%s340_s3 + $0x10] sm:$0xff] %vm126_vm0, %v118_v36 }

</bundles_post_ra>
